<compile_context>
chip_gen: v7x
topology: tpu7x:2x2x1
jax: 0.10.0
libtpu: 0.0.40
codegen_flags: <defaults>
</compile_context>

<pallas_src>
import numpy as np
import jax
import jax.numpy as jnp
from jax.experimental import pallas as pl
from jax.experimental.pallas import tpu as pltpu

C_IN, C_OUT, KSIZE = 10, 16, 3
C_PAD = 16  # Cin padded to a sublane-tile multiple so tap blocks are tile-aligned in the patch slab


def _make_conv_kernel(N, Cin, KH, KW, W_img, HW):
    NHW = N * HW

    def kernel(x_ref, w_ref, b_ref, o_ref, slab_ref, patch_ref):
        # x_ref:    (N, Cin, HW)        f32   raw flattened NCHW activations
        # w_ref:    (Cout, KH*KW*C_PAD) bf16  im2col weight matrix (channel-padded cols are zero)
        # b_ref:    (Cout, 1)           f32   bias
        # o_ref:    (N, Cout, HW)       f32   lane-dense output slab
        # slab_ref: (C_PAD, slab_w)     f32   VMEM scratch: batch-contiguous, zero-padded activations
        # patch_ref:(KH*KW*C_PAD, NHW)  bf16  VMEM scratch: im2col patch matrix

        # Zero once: covers channel-pad rows (Cin..C_PAD-1) and the spatial zero tail.
        slab_ref[...] = jnp.zeros_like(slab_ref)

        # Fold the batch into lanes: images laid out contiguously -> rows 0..Cin-1, lanes [n*HW,(n+1)*HW).
        for n in range(N):
            slab_ref[0:Cin, n * HW:(n + 1) * HW] = x_ref[n]

        slab = slab_ref[...]                               # (C_PAD, slab_w), held in vregs

        # im2col: ONE lane-shifted slice per tap covers all N images at once.  Overhang lanes read
        # the next image / zero tail -> only positions the wrapper discards.  Cast to bf16 on the
        # way into the scratch (halves patch traffic; MXU is bf16-native on all gens).
        for kh in range(KH):
            for kw in range(KW):
                t = kh * KW + kw
                s = kh * W_img + kw
                patch_ref[t * C_PAD:(t + 1) * C_PAD, :] = (
                    slab[:, s:s + NHW].astype(patch_ref.dtype))

        # Single MXU matmul for the whole batch: (Cout, K) @ (K, N*HW), f32 accumulate.
        acc = jnp.dot(w_ref[...], patch_ref[...],
                      preferred_element_type=jnp.float32)
        acc = acc + b_ref[...]                             # (Cout,1) broadcast over lanes

        # Lane-aligned (multiples of 128), unmasked per-image stores.
        for n in range(N):
            o_ref[n] = acc[:, n * HW:(n + 1) * HW].astype(o_ref.dtype)

    return kernel


def prep_conv_params(w_oihw, bias):
    """One-time weight/bias prep, hoisted OUT of the per-call jit path (weights are static)."""
    Cout, Cin, KH, KW = w_oihw.shape
    w_t = jnp.transpose(w_oihw, (0, 2, 3, 1))                        # (Cout, KH, KW, Cin)
    w_t = jnp.pad(w_t, ((0, 0), (0, 0), (0, 0), (0, C_PAD - Cin)))   # zero-pad channels -> C_PAD
    w_mat = w_t.reshape(Cout, KH * KW * C_PAD).astype(jnp.bfloat16)  # im2col weights, bf16
    bias2d = bias.reshape(Cout, 1).astype(jnp.float32)
    return w_mat, bias2d


@jax.jit
def conv2d_pallas(x_nchw, w_mat, bias2d):
    """Conv2d forward, stride=1, padding=0 (VALID), dilation=1.

    x_nchw: (N, Cin, H, W) f32; w_mat/bias2d from prep_conv_params -> (N, Cout, Ho, Wo) f32.
    NOTE: the wrap-then-slice border trick below is only valid for stride=1 / padding=0 / dilation=1.
    """
    N, Cin, H, W = x_nchw.shape
    Cout = w_mat.shape[0]
    KH = KW = KSIZE
    Ho, Wo = H - KH + 1, W - KW + 1
    HW = H * W
    NHW = N * HW
    pad_sp = (KH - 1) * W + (KW - 1)                       # max tap lane-offset
    slab_w = NHW + ((pad_sp + 127) // 128) * 128           # lane-tile-rounded zero tail

    x_flat = x_nchw.reshape(N, Cin, HW)                    # free reshape, no transposes

    kernel = _make_conv_kernel(N, Cin, KH, KW, W, HW)

    out_flat = pl.pallas_call(
        kernel,
        out_shape=jax.ShapeDtypeStruct((N, Cout, HW), x_nchw.dtype),
        # No grid: single invocation, whole arrays resident in VMEM (everything is tiny:
        # slab 40 KB + patches 144 KB + in/out < 60 KB, far under VMEM on v5e/v6e/v7x).
        scratch_shapes=[
            pltpu.VMEM((C_PAD, slab_w), jnp.float32),            # padded activation slab
            pltpu.VMEM((KH * KW * C_PAD, NHW), jnp.bfloat16),    # im2col patch matrix
        ],
        cost_estimate=pl.CostEstimate(
            flops=2 * N * Cout * Cin * KH * KW * HW,             # honest FLOPs (unpadded Cin)
            transcendentals=0,
            bytes_accessed=4 * (N * Cin * HW + N * Cout * HW)
                           + 2 * Cout * KH * KW * C_PAD),
    )(x_flat, w_mat, bias2d)

    # Free reshape + tiny slice: drop right/bottom positions whose tap window wrapped.
    return out_flat.reshape(N, Cout, H, W)[:, :, :Ho, :Wo]


if __name__ == "__main__":
    key = jax.random.PRNGKey(0)
    kx, kw, kb = jax.random.split(key, 3)

    N, H, W = 2, 16, 16
    x = jax.random.normal(kx, (N, C_IN, H, W), dtype=jnp.float32)

    # Deterministic parameter init (matches nn.Conv2d parameter shapes).
    fan_in = C_IN * KSIZE * KSIZE
    bound = 1.0 / np.sqrt(fan_in)
    weight = jax.random.uniform(kw, (C_OUT, C_IN, KSIZE, KSIZE),
                                dtype=jnp.float32, minval=-bound, maxval=bound)
    bias = jax.random.uniform(kb, (C_OUT,), dtype=jnp.float32,
                              minval=-bound, maxval=bound)

    # One-time weight prep, outside the per-call path.
    w_mat, bias2d = prep_conv_params(weight, bias)

    out = jax.block_until_ready(conv2d_pallas(x, w_mat, bias2d))

    # Reference check against XLA convolution (NCHW, VALID, stride 1).
    ref = jax.lax.conv_general_dilated(
        x, weight, window_strides=(1, 1), padding="VALID",
        dimension_numbers=("NCHW", "OIHW", "NCHW"),
    ) + bias[None, :, None, None]
    ref = jax.block_until_ready(ref)

    assert out.shape == (N, C_OUT, H - KSIZE + 1, W - KSIZE + 1), out.shape
    assert np.allclose(np.asarray(out), np.asarray(ref), rtol=1e-2, atol=1e-2), (
        float(jnp.max(jnp.abs(out - ref))))
    print("KERNEL_OK")
</pallas_src>

<mosaic_0001>
module attributes {stable_mosaic.version = 11 : i64} {
  func.func @kernel(%arg0: memref<2x10x256xf32, #tpu.memory_space<vmem>>, %arg1: memref<16x144xbf16, #tpu.memory_space<vmem>>, %arg2: memref<16x1xf32, #tpu.memory_space<vmem>>, %arg3: memref<2x16x256xf32, #tpu.memory_space<vmem>>, %arg4: memref<16x640xf32, #tpu.memory_space<vmem>>, %arg5: memref<144x512xbf16, #tpu.memory_space<vmem>>) attributes {dimension_semantics = [], scalar_prefetch = 0 : i64, scratch_operands = 2 : i64, tpu.core_type = #tpu.core_type<tc>} {
    %cst = arith.constant 0.000000e+00 : f32
    %0 = vector.broadcast %cst : f32 to vector<16x640xf32>
    %c0 = arith.constant 0 : index
    %c0_0 = arith.constant 0 : index
    %1 = vector.load %arg4[%c0, %c0_0] : memref<16x640xf32, #tpu.memory_space<vmem>>, vector<16x640xf32>
    tpu.vector_store %arg4[%c0, %c0_0], %0 {strides = array<i32>} : memref<16x640xf32, #tpu.memory_space<vmem>>, vector<16x640xf32>,
    %c0_1 = arith.constant 0 : index
    %c0_2 = arith.constant 0 : index
    %c0_3 = arith.constant 0 : index
    %2 = vector.load %arg0[%c0_1, %c0_2, %c0_3] : memref<2x10x256xf32, #tpu.memory_space<vmem>>, vector<1x10x256xf32>
    %3 = vector.shape_cast %2 : vector<1x10x256xf32> to vector<10x256xf32>
    %c0_4 = arith.constant 0 : index
    %c0_5 = arith.constant 0 : index
    %4 = vector.load %arg4[%c0_4, %c0_5] : memref<16x640xf32, #tpu.memory_space<vmem>>, vector<10x256xf32>
    tpu.vector_store %arg4[%c0_4, %c0_5], %3 {strides = array<i32>} : memref<16x640xf32, #tpu.memory_space<vmem>>, vector<10x256xf32>,
    %c1 = arith.constant 1 : index
    %c0_6 = arith.constant 0 : index
    %c0_7 = arith.constant 0 : index
    %5 = vector.load %arg0[%c1, %c0_6, %c0_7] : memref<2x10x256xf32, #tpu.memory_space<vmem>>, vector<1x10x256xf32>
    %6 = vector.shape_cast %5 : vector<1x10x256xf32> to vector<10x256xf32>
    %c0_8 = arith.constant 0 : index
    %c256 = arith.constant 256 : index
    %7 = vector.load %arg4[%c0_8, %c256] : memref<16x640xf32, #tpu.memory_space<vmem>>, vector<10x256xf32>
    tpu.vector_store %arg4[%c0_8, %c256], %6 {strides = array<i32>} : memref<16x640xf32, #tpu.memory_space<vmem>>, vector<10x256xf32>,
    %c0_9 = arith.constant 0 : index
    %c0_10 = arith.constant 0 : index
    %8 = vector.load %arg4[%c0_9, %c0_10] : memref<16x640xf32, #tpu.memory_space<vmem>>, vector<16x640xf32>
    %9 = vector.extract_strided_slice %8 {offsets = [0, 0], sizes = [16, 512], strides = [1, 1]} : vector<16x640xf32> to vector<16x512xf32>
    %10 = arith.truncf %9 : vector<16x512xf32> to vector<16x512xbf16>
    %c0_11 = arith.constant 0 : index
    %c0_12 = arith.constant 0 : index
    %11 = vector.load %arg5[%c0_11, %c0_12] : memref<144x512xbf16, #tpu.memory_space<vmem>>, vector<16x512xbf16>
    tpu.vector_store %arg5[%c0_11, %c0_12], %10 {strides = array<i32>} : memref<144x512xbf16, #tpu.memory_space<vmem>>, vector<16x512xbf16>,
    %12 = vector.extract_strided_slice %8 {offsets = [0, 1], sizes = [16, 512], strides = [1, 1]} : vector<16x640xf32> to vector<16x512xf32>
    %13 = arith.truncf %12 : vector<16x512xf32> to vector<16x512xbf16>
    %c16 = arith.constant 16 : index
    %c0_13 = arith.constant 0 : index
    %14 = vector.load %arg5[%c16, %c0_13] : memref<144x512xbf16, #tpu.memory_space<vmem>>, vector<16x512xbf16>
    tpu.vector_store %arg5[%c16, %c0_13], %13 {strides = array<i32>} : memref<144x512xbf16, #tpu.memory_space<vmem>>, vector<16x512xbf16>,
    %15 = vector.extract_strided_slice %8 {offsets = [0, 2], sizes = [16, 512], strides = [1, 1]} : vector<16x640xf32> to vector<16x512xf32>
    %16 = arith.truncf %15 : vector<16x512xf32> to vector<16x512xbf16>
    %c32 = arith.constant 32 : index
    %c0_14 = arith.constant 0 : index
    %17 = vector.load %arg5[%c32, %c0_14] : memref<144x512xbf16, #tpu.memory_space<vmem>>, vector<16x512xbf16>
    tpu.vector_store %arg5[%c32, %c0_14], %16 {strides = array<i32>} : memref<144x512xbf16, #tpu.memory_space<vmem>>, vector<16x512xbf16>,
    %18 = vector.extract_strided_slice %8 {offsets = [0, 16], sizes = [16, 512], strides = [1, 1]} : vector<16x640xf32> to vector<16x512xf32>
    %19 = arith.truncf %18 : vector<16x512xf32> to vector<16x512xbf16>
    %c48 = arith.constant 48 : index
    %c0_15 = arith.constant 0 : index
    %20 = vector.load %arg5[%c48, %c0_15] : memref<144x512xbf16, #tpu.memory_space<vmem>>, vector<16x512xbf16>
    tpu.vector_store %arg5[%c48, %c0_15], %19 {strides = array<i32>} : memref<144x512xbf16, #tpu.memory_space<vmem>>, vector<16x512xbf16>,
    %21 = vector.extract_strided_slice %8 {offsets = [0, 17], sizes = [16, 512], strides = [1, 1]} : vector<16x640xf32> to vector<16x512xf32>
    %22 = arith.truncf %21 : vector<16x512xf32> to vector<16x512xbf16>
    %c64 = arith.constant 64 : index
    %c0_16 = arith.constant 0 : index
    %23 = vector.load %arg5[%c64, %c0_16] : memref<144x512xbf16, #tpu.memory_space<vmem>>, vector<16x512xbf16>
    tpu.vector_store %arg5[%c64, %c0_16], %22 {strides = array<i32>} : memref<144x512xbf16, #tpu.memory_space<vmem>>, vector<16x512xbf16>,
    %24 = vector.extract_strided_slice %8 {offsets = [0, 18], sizes = [16, 512], strides = [1, 1]} : vector<16x640xf32> to vector<16x512xf32>
    %25 = arith.truncf %24 : vector<16x512xf32> to vector<16x512xbf16>
    %c80 = arith.constant 80 : index
    %c0_17 = arith.constant 0 : index
    %26 = vector.load %arg5[%c80, %c0_17] : memref<144x512xbf16, #tpu.memory_space<vmem>>, vector<16x512xbf16>
    tpu.vector_store %arg5[%c80, %c0_17], %25 {strides = array<i32>} : memref<144x512xbf16, #tpu.memory_space<vmem>>, vector<16x512xbf16>,
    %27 = vector.extract_strided_slice %8 {offsets = [0, 32], sizes = [16, 512], strides = [1, 1]} : vector<16x640xf32> to vector<16x512xf32>
    %28 = arith.truncf %27 : vector<16x512xf32> to vector<16x512xbf16>
    %c96 = arith.constant 96 : index
    %c0_18 = arith.constant 0 : index
    %29 = vector.load %arg5[%c96, %c0_18] : memref<144x512xbf16, #tpu.memory_space<vmem>>, vector<16x512xbf16>
    tpu.vector_store %arg5[%c96, %c0_18], %28 {strides = array<i32>} : memref<144x512xbf16, #tpu.memory_space<vmem>>, vector<16x512xbf16>,
    %30 = vector.extract_strided_slice %8 {offsets = [0, 33], sizes = [16, 512], strides = [1, 1]} : vector<16x640xf32> to vector<16x512xf32>
    %31 = arith.truncf %30 : vector<16x512xf32> to vector<16x512xbf16>
    %c112 = arith.constant 112 : index
    %c0_19 = arith.constant 0 : index
    %32 = vector.load %arg5[%c112, %c0_19] : memref<144x512xbf16, #tpu.memory_space<vmem>>, vector<16x512xbf16>
    tpu.vector_store %arg5[%c112, %c0_19], %31 {strides = array<i32>} : memref<144x512xbf16, #tpu.memory_space<vmem>>, vector<16x512xbf16>,
    %33 = vector.extract_strided_slice %8 {offsets = [0, 34], sizes = [16, 512], strides = [1, 1]} : vector<16x640xf32> to vector<16x512xf32>
    %34 = arith.truncf %33 : vector<16x512xf32> to vector<16x512xbf16>
    %c128 = arith.constant 128 : index
    %c0_20 = arith.constant 0 : index
    %35 = vector.load %arg5[%c128, %c0_20] : memref<144x512xbf16, #tpu.memory_space<vmem>>, vector<16x512xbf16>
    tpu.vector_store %arg5[%c128, %c0_20], %34 {strides = array<i32>} : memref<144x512xbf16, #tpu.memory_space<vmem>>, vector<16x512xbf16>,
    %c0_21 = arith.constant 0 : index
    %c0_22 = arith.constant 0 : index
    %36 = vector.load %arg1[%c0_21, %c0_22] : memref<16x144xbf16, #tpu.memory_space<vmem>>, vector<16x144xbf16>
    %c0_23 = arith.constant 0 : index
    %c0_24 = arith.constant 0 : index
    %37 = vector.load %arg5[%c0_23, %c0_24] : memref<144x512xbf16, #tpu.memory_space<vmem>>, vector<144x512xbf16>
    %cst_25 = arith.constant dense<0.000000e+00> : vector<16x512xf32>
    %38 = tpu.matmul %36, %37, %cst_25 {dimension_numbers = #tpu.dot_dimension_numbers<[1], [0], [0], [1], [0, 0, 1, 1], [], []>} : vector<16x144xbf16>, vector<144x512xbf16>, vector<16x512xf32> -> vector<16x512xf32>
    %c0_26 = arith.constant 0 : index
    %c0_27 = arith.constant 0 : index
    %39 = vector.load %arg2[%c0_26, %c0_27] : memref<16x1xf32, #tpu.memory_space<vmem>>, vector<16x1xf32>
    %40 = vector.broadcast %39 : vector<16x1xf32> to vector<16x512xf32>
    %41 = arith.addf %38, %40 : vector<16x512xf32>
    %42 = vector.extract_strided_slice %41 {offsets = [0, 0], sizes = [16, 256], strides = [1, 1]} : vector<16x512xf32> to vector<16x256xf32>
    %c0_28 = arith.constant 0 : index
    %c0_29 = arith.constant 0 : index
    %c0_30 = arith.constant 0 : index
    %43 = vector.load %arg3[%c0_28, %c0_29, %c0_30] : memref<2x16x256xf32, #tpu.memory_space<vmem>>, vector<1x16x256xf32>
    %44 = vector.shape_cast %43 : vector<1x16x256xf32> to vector<16x256xf32>
    %45 = vector.shape_cast %42 : vector<16x256xf32> to vector<1x16x256xf32>
    tpu.vector_store %arg3[%c0_28, %c0_29, %c0_30], %45 {strides = array<i32>} : memref<2x16x256xf32, #tpu.memory_space<vmem>>, vector<1x16x256xf32>,
    %46 = vector.extract_strided_slice %41 {offsets = [0, 256], sizes = [16, 256], strides = [1, 1]} : vector<16x512xf32> to vector<16x256xf32>
    %c1_31 = arith.constant 1 : index
    %c0_32 = arith.constant 0 : index
    %c0_33 = arith.constant 0 : index
    %47 = vector.load %arg3[%c1_31, %c0_32, %c0_33] : memref<2x16x256xf32, #tpu.memory_space<vmem>>, vector<1x16x256xf32>
    %48 = vector.shape_cast %47 : vector<1x16x256xf32> to vector<16x256xf32>
    %49 = vector.shape_cast %46 : vector<16x256xf32> to vector<1x16x256xf32>
    tpu.vector_store %arg3[%c1_31, %c0_32, %c0_33], %49 {strides = array<i32>} : memref<2x16x256xf32, #tpu.memory_space<vmem>>, vector<1x16x256xf32>,
    return
  }
}

</mosaic_0001>

<bundles_post_ra>
// kernel: conv2d_pallas.1
= control target key start
LH: loop header
LB: loop body
LE: loop exit
PB: predicated region body
PF: predicated region fallthrough
CT: control target
= control target key end

     0   :  { %v439_v0 = vmov 0.0   ;;  %v440_v7 = vmov 0.0|0.0   ;;  %s441_s24 = smov 127   ;;  %s442_s29 = smov 126   ;;  %vm309_vm0 = vcmask 130048   ;;  %v449_v19 = vmov 0   ;;  %s538_s0 = inlined_call_operand.vmem [shape: f32[2,10,256], index: 0, kind: input, shape index: {}]   ;;  %s539_s1 = inlined_call_operand.vmem [shape: bf16[16,144], index: 1, kind: input, shape index: {}]   ;;  %s540_s2 = inlined_call_operand.vmem [shape: f32[16,1], index: 2, kind: input, shape index: {}]   ;;  %s541_s3 = inlined_call_operand.vmem [shape: f32[2,16,256], index: 3, kind: output, shape index: {}]  }
   0x1   :  { %20 = vst [vmem:[#allocation2 + $0x28] sm:$0xff] %v439_v0  ;;  %21 = vst [vmem:[#allocation2 + $0x30] sm:$0xff] %v439_v0  ;;  %v26_v1 = vld [vmem:[%s538_s0 + $0x8] sm:$0xff]  ;;  %v28_v2 = vld [vmem:[%s538_s0 + $0x18] sm:$0x3]  ;;  %74 = vrot.lane.b32.xlu1 %v440_v7, %s441_s24  ;;  %s444_s30 = smov 111   ;;  %434 = vset.pattern.permute.xlu0 %v449_v19 }
   0x2   :  { %22 = vst [vmem:[#allocation2 + $0x38] sm:$0xff] %v439_v0  ;;  %23 = vst [vmem:[#allocation2 + $0x40] sm:$0xff] %v439_v0  ;;  %v413_v3 = vld [vmem:[%s538_s0 + $0x28] sm:$0xff]  ;;  %v415_v4 = vld [vmem:[%s538_s0 + $0x38] sm:$0x3]  ;;  %s445_s4 = smov 110   ;;  %435 = vset.pattern.permute.xlu1 %v449_v19 }
   0x3   :  { %32 = vst [vmem:[#allocation2 + $0x30] sm:$0x3] %v28_v2  ;;  %v412_v5 = vld [vmem:[%s538_s0 + $0x20] sm:$0xff]  ;;  %v414_v6 = vld [vmem:[%s538_s0 + $0x30] sm:$0x3]  ;;  %s446_s5 = smov 96  }
   0x4   :  { %41 = vst [vmem:[#allocation2 + $0x40] sm:$0x3] %v415_v4  ;;  %40 = vst [vmem:[#allocation2 + $0x38] sm:$0x3] %v414_v6  ;;  %v25_v8 = vld [vmem:[%s538_s0] sm:$0xff]  ;;  %s447_s6 = smov 95  }
   0x5   :  { %v27_v9 = vld [vmem:[%s538_s0 + $0x10] sm:$0x3]  ;;  %s443_s0 = smov 112   ;;  %v438_v18 = vld [vmem:[%s539_s1 + $0x4] ss:$8 sps:$4 sm:$0xff]   ;;  %s448_s9 = smov 94  }
   0x6   :  { %31 = vst [vmem:[#allocation2 + $0x28] sm:$0x3] %v27_v9  ;;  %418 = vmatprep.mubr.msk.bf16.mxu0 %vm309_vm0, %v438_v18  ;;  %419 = vmatprep.mubr.msk.bf16.mxu1 %vm309_vm0, %v438_v18  ;;  %v289_v20 = vld [vmem:[%s540_s2 + $0x8] sm:$0xff]  ;;  %v288_v21 = vld [vmem:[%s540_s2] sm:$0xff]  ;;  %vm76_vm1 = vcmask 1039360   ;;  %vm99_vm2 = vcmask 1031168  }
   0x7   :  { %vm122_vm3 = vcmask 916480   ;;  %vm145_vm4 = vcmask 908288   ;;  %vm168_vm5 = vcmask 900096   ;;  %vm191_vm6 = vcmask 785408  }
   0x8   :  { %vm214_vm7 = vcmask 777216   ;;  %vm237_vm8 = vcmask 769024  }
   0xa   :  { %v48_v10 = vld [vmem:[#allocation2 + $0x30] sm:$0xff] }
   0xb   :  { %v53_v11 = vpack.c.bf16 %v48_v10, %v26_v1  ;;  %v50_v12 = vld [vmem:[#allocation2 + $0x40] sm:$0xff]  ;;  %v49_v13 = vld [vmem:[#allocation2 + $0x38] sm:$0xff] }
   0xc   :  { %v55_v14 = vpack.c.bf16 %v50_v12, %v413_v3  ;;  %v54_v16 = vpack.c.bf16 %v49_v13, %v412_v5 }
   0xd   :  { %v47_v15 = vld [vmem:[#allocation2 + $0x28] sm:$0xff]  ;;  %68 = vrot.lane.b32.xlu0 %v53_v11, %s441_s24  ;;  %313 = vmatprep.subr.bf16.mxu0 %v53_v11 }
   0xe   :  { %v52_v17 = vpack.c.bf16 %v47_v15, %v25_v8  ;;  %72 = vrot.lane.b32.xlu1 %v55_v14, %s441_s24  ;;  %356 = vmatprep.subr.bf16.mxu1 %v55_v14 }
   0xf   :  { %357 = vmatpush1.bf16.msra.mxu1 %v54_v16 }
  0x10   :  { %314 = vmatpush1.bf16.msra.mxu0 %v52_v17 }
  0x11   :  { %70 = vrot.lane.b32.xlu0 %v54_v16, %s441_s24 }
  0x12   :  { %91 = vrot.lane.b32.xlu1 %v53_v11, %s442_s29 }
  0x15   :  { %66 = vrot.lane.b32.xlu0 %v52_v17, %s441_s24 }
  0x16   :  { %95 = vrot.lane.b32.xlu1 %v55_v14, %s442_s29 }
  0x19   :  { %93 = vrot.lane.b32.xlu0 %v54_v16, %s442_s29 }
  0x1a   :  { %89 = vrot.lane.b32.xlu1 %v52_v17, %s442_s29 }
  0x1d   :  { %97 = vrot.lane.b32.xlu0 %v440_v7, %s442_s29 }
  0x1e   :  { %116 = vrot.lane.b32.xlu1 %v54_v16, %s443_s0 }
  0x21   :  { %114 = vrot.lane.b32.xlu0 %v53_v11, %s443_s0 }
  0x22   :  { %120 = vrot.lane.b32.xlu1 %v440_v7, %s443_s0 }
  0x25   :  { %118 = vrot.lane.b32.xlu0 %v55_v14, %s443_s0 }
  0x26   :  { %137 = vrot.lane.b32.xlu1 %v53_v11, %s444_s30 }
  0x29   :  { %112 = vrot.lane.b32.xlu0 %v52_v17, %s443_s0 }
  0x2a   :  { %141 = vrot.lane.b32.xlu1 %v55_v14, %s444_s30 }
  0x2d   :  { %139 = vrot.lane.b32.xlu0 %v54_v16, %s444_s30 }
  0x2e   :  { %135 = vrot.lane.b32.xlu1 %v52_v17, %s444_s30 }
  0x31   :  { %143 = vrot.lane.b32.xlu0 %v440_v7, %s444_s30 }
  0x32   :  { %162 = vrot.lane.b32.xlu1 %v54_v16, %s445_s4 }
  0x35   :  { %160 = vrot.lane.b32.xlu0 %v53_v11, %s445_s4 }
  0x36   :  { %166 = vrot.lane.b32.xlu1 %v440_v7, %s445_s4 }
  0x39   :  { %164 = vrot.lane.b32.xlu0 %v55_v14, %s445_s4 }
  0x3a   :  { %183 = vrot.lane.b32.xlu1 %v53_v11, %s446_s5 }
  0x3d   :  { %158 = vrot.lane.b32.xlu0 %v52_v17, %s445_s4 }
  0x3e   :  { %187 = vrot.lane.b32.xlu1 %v55_v14, %s446_s5 }
  0x41   :  { %185 = vrot.lane.b32.xlu0 %v54_v16, %s446_s5 }
  0x42   :  { %181 = vrot.lane.b32.xlu1 %v52_v17, %s446_s5 }
  0x45   :  { %189 = vrot.lane.b32.xlu0 %v440_v7, %s446_s5 }
  0x46   :  { %208 = vrot.lane.b32.xlu1 %v54_v16, %s447_s6 }
  0x49   :  { %206 = vrot.lane.b32.xlu0 %v53_v11, %s447_s6 }
  0x4a   :  { %212 = vrot.lane.b32.xlu1 %v440_v7, %s447_s6 }
  0x4d   :  { %210 = vrot.lane.b32.xlu0 %v55_v14, %s447_s6 }
  0x4e   :  { %229 = vrot.lane.b32.xlu1 %v53_v11, %s448_s9 }
  0x51   :  { %204 = vrot.lane.b32.xlu0 %v52_v17, %s447_s6 }
  0x52   :  { %233 = vrot.lane.b32.xlu1 %v55_v14, %s448_s9 }
  0x55   :  { %231 = vrot.lane.b32.xlu0 %v54_v16, %s448_s9 }
  0x56   :  { %227 = vrot.lane.b32.xlu1 %v52_v17, %s448_s9 }
  0x59   :  { %235 = vrot.lane.b32.xlu0 %v440_v7, %s448_s9 }
  0x5a   :  { %297 = vperm.xlu1 %435, %v289_v20  }
  0x5d   :  { %292 = vperm.xlu0 %434, %v288_v21  }
  0x73   :  { %v75_v22 = vpop.permute.xlu1 %74 }
  0x7f   :  { %v69_v23 = vpop.permute.xlu0 %68 }
  0x80   :  { %v73_v24 = vpop.permute.xlu1 %72 }
  0x81   :  { %v80_v25 = vsel %vm76_vm1, %v73_v24, %v75_v22 }
  0x82   :  { %358 = vmatprep.subr.bf16.mxu1 %v80_v25 }
  0x83   :  { %v71_v26 = vpop.permute.xlu0 %70 }
  0x84   :  { %v78_v27 = vsel %vm76_vm1, %v69_v23, %v71_v26  ;;  %v79_v28 = vsel %vm76_vm1, %v71_v26, %v73_v24  ;;  %v92_v29 = vpop.permute.xlu1 %91 }
  0x85   :  { %315 = vmatprep.subr.bf16.mxu0 %v78_v27  ;;  %359 = vmatpush1.bf16.msra.mxu1 %v79_v28  ;;  %v436_v27 = vld [vmem:[%s539_s1] ss:$8 sps:$4 sm:$0xff]  }
  0x87   :  { %v67_v30 = vpop.permute.xlu0 %66 }
  0x88   :  { %v77_v31 = vsel %vm76_vm1, %v67_v30, %v69_v23  ;;  %v96_v32 = vpop.permute.xlu1 %95 }
  0x89   :  { %316 = vmatpush1.bf16.msra.mxu0 %v77_v31 }
  0x8b   :  { %v94_v33 = vpop.permute.xlu0 %93 }
  0x8c   :  { %v101_v34 = vsel %vm99_vm2, %v92_v29, %v94_v33  ;;  %v90_v35 = vpop.permute.xlu1 %89  ;;  %v102_v40 = vsel %vm99_vm2, %v94_v33, %v96_v32 }
  0x8d   :  { %317 = vmatprep.subr.bf16.mxu0 %v101_v34  ;;  %v100_v36 = vsel %vm99_vm2, %v90_v35, %v92_v29 }
  0x8e   :  { %318 = vmatpush1.bf16.msra.mxu0 %v100_v36 }
  0x8f   :  { %v98_v37 = vpop.permute.xlu0 %97 }
  0x90   :  { %v103_v38 = vsel %vm99_vm2, %v96_v32, %v98_v37  ;;  %v117_v39 = vpop.permute.xlu1 %116 }
  0x91   :  { %360 = vmatprep.subr.bf16.mxu1 %v103_v38 }
  0x92   :  { %361 = vmatpush1.bf16.msra.mxu1 %v102_v40 }
  0x93   :  { %v115_v41 = vpop.permute.xlu0 %114 }
  0x94   :  { %v124_v42 = vsel %vm122_vm3, %v115_v41, %v117_v39  ;;  %v121_v43 = vpop.permute.xlu1 %120 }
  0x95   :  { %319 = vmatprep.subr.bf16.mxu0 %v124_v42 }
  0x97   :  { %v119_v44 = vpop.permute.xlu0 %118 }
  0x98   :  { %v126_v45 = vsel %vm122_vm3, %v119_v44, %v121_v43  ;;  %v138_v46 = vpop.permute.xlu1 %137  ;;  %v125_v47 = vsel %vm122_vm3, %v117_v39, %v119_v44 }
  0x99   :  { %362 = vmatprep.subr.bf16.mxu1 %v126_v45 }
  0x9a   :  { %363 = vmatpush1.bf16.msra.mxu1 %v125_v47 }
  0x9b   :  { %v113_v48 = vpop.permute.xlu0 %112 }
  0x9c   :  { %v123_v49 = vsel %vm122_vm3, %v113_v48, %v115_v41  ;;  %v142_v50 = vpop.permute.xlu1 %141 }
  0x9d   :  { %320 = vmatpush1.bf16.msra.mxu0 %v123_v49 }
  0x9f   :  { %v140_v51 = vpop.permute.xlu0 %139 }
  0xa0   :  { %v147_v52 = vsel %vm145_vm4, %v138_v46, %v140_v51  ;;  %v136_v53 = vpop.permute.xlu1 %135  ;;  %v148_v58 = vsel %vm145_vm4, %v140_v51, %v142_v50 }
  0xa1   :  { %321 = vmatprep.subr.bf16.mxu0 %v147_v52  ;;  %v146_v54 = vsel %vm145_vm4, %v136_v53, %v138_v46 }
  0xa2   :  { %322 = vmatpush1.bf16.msra.mxu0 %v146_v54 }
  0xa3   :  { %v144_v55 = vpop.permute.xlu0 %143 }
  0xa4   :  { %v149_v56 = vsel %vm145_vm4, %v142_v50, %v144_v55  ;;  %v163_v57 = vpop.permute.xlu1 %162 }
  0xa5   :  { %364 = vmatprep.subr.bf16.mxu1 %v149_v56 }
  0xa6   :  { %365 = vmatpush1.bf16.msra.mxu1 %v148_v58 }
  0xa7   :  { %v161_v59 = vpop.permute.xlu0 %160 }
  0xa8   :  { %v170_v60 = vsel %vm168_vm5, %v161_v59, %v163_v57  ;;  %v167_v61 = vpop.permute.xlu1 %166 }
  0xa9   :  { %323 = vmatprep.subr.bf16.mxu0 %v170_v60 }
  0xab   :  { %v165_v62 = vpop.permute.xlu0 %164 }
  0xac   :  { %v172_v63 = vsel %vm168_vm5, %v165_v62, %v167_v61  ;;  %v184_v0 = vpop.permute.xlu1 %183  ;;  %v171_v1 = vsel %vm168_vm5, %v163_v57, %v165_v62 }
  0xad   :  { %366 = vmatprep.subr.bf16.mxu1 %v172_v63 }
  0xae   :  { %367 = vmatpush1.bf16.msra.mxu1 %v171_v1 }
  0xaf   :  { %v159_v2 = vpop.permute.xlu0 %158 }
  0xb0   :  { %v169_v3 = vsel %vm168_vm5, %v159_v2, %v161_v59  ;;  %v188_v4 = vpop.permute.xlu1 %187 }
  0xb1   :  { %324 = vmatpush1.bf16.msra.mxu0 %v169_v3 }
  0xb3   :  { %v186_v5 = vpop.permute.xlu0 %185 }
  0xb4   :  { %v193_v6 = vsel %vm191_vm6, %v184_v0, %v186_v5  ;;  %v182_v7 = vpop.permute.xlu1 %181  ;;  %v194_v12 = vsel %vm191_vm6, %v186_v5, %v188_v4 }
  0xb5   :  { %325 = vmatprep.subr.bf16.mxu0 %v193_v6  ;;  %v192_v8 = vsel %vm191_vm6, %v182_v7, %v184_v0 }
  0xb6   :  { %326 = vmatpush1.bf16.msra.mxu0 %v192_v8 }
  0xb7   :  { %v190_v9 = vpop.permute.xlu0 %189 }
  0xb8   :  { %v195_v10 = vsel %vm191_vm6, %v188_v4, %v190_v9  ;;  %v209_v11 = vpop.permute.xlu1 %208 }
  0xb9   :  { %368 = vmatprep.subr.bf16.mxu1 %v195_v10 }
  0xba   :  { %369 = vmatpush1.bf16.msra.mxu1 %v194_v12 }
  0xbb   :  { %v207_v13 = vpop.permute.xlu0 %206 }
  0xbc   :  { %v216_v14 = vsel %vm214_vm7, %v207_v13, %v209_v11  ;;  %v213_v15 = vpop.permute.xlu1 %212 }
  0xbd   :  { %327 = vmatprep.subr.bf16.mxu0 %v216_v14 }
  0xbf   :  { %v211_v16 = vpop.permute.xlu0 %210 }
  0xc0   :  { %v218_v17 = vsel %vm214_vm7, %v211_v16, %v213_v15  ;;  %v230_v18 = vpop.permute.xlu1 %229  ;;  %v217_v19 = vsel %vm214_vm7, %v209_v11, %v211_v16 }
  0xc1   :  { %370 = vmatprep.subr.bf16.mxu1 %v218_v17 }
  0xc2   :  { %371 = vmatpush1.bf16.msra.mxu1 %v217_v19 }
  0xc3   :  { %v205_v20 = vpop.permute.xlu0 %204 }
  0xc4   :  { %v215_v21 = vsel %vm214_vm7, %v205_v20, %v207_v13  ;;  %v234_v22 = vpop.permute.xlu1 %233 }
  0xc5   :  { %328 = vmatpush1.bf16.msra.mxu0 %v215_v21 }
  0xc7   :  { %v232_v23 = vpop.permute.xlu0 %231 }
  0xc8   :  { %v239_v24 = vsel %vm237_vm8, %v230_v18, %v232_v23  ;;  %v228_v25 = vpop.permute.xlu1 %227  ;;  %v240_v30 = vsel %vm237_vm8, %v232_v23, %v234_v22 }
  0xc9   :  { %329 = vmatprep.subr.bf16.mxu0 %v239_v24  ;;  %v238_v26 = vsel %vm237_vm8, %v228_v25, %v230_v18 }
  0xca   :  { %330 = vmatpush1.bf16.msra.mxu0 %v238_v26 }
  0xcb   :  { %v236_v28 = vpop.permute.xlu0 %235 }
  0xcc   :  { %v241_v29 = vsel %vm237_vm8, %v234_v22, %v236_v28 }
  0xcd   :  { %372 = vmatprep.subr.bf16.mxu1 %v241_v29  ;;  %346 = vmatmul.mubr.bf16.vlgmr.msra.gmra.mrb[0].mxu0 %v436_v27 }
  0xce   :  { %373 = vmatpush1.bf16.msra.mxu1 %v240_v30 }
  0xd1   :  { %389 = vmatmul.mubr.bf16.vlgmr.msra.gmra.mrb[0].mxu1 %v436_v27 }
  0xd9   :  { %v298_v33 = vpop.permute.xlu1 %297 }
  0xdc   :  { %v293_v31 = vpop.permute.xlu0 %292 }
 0x1a0   :  { %v347_v32 = vpop.f32.mrb[0].mxu0 }
 0x1a1   :  { %v349_v34 = vpop.f32.mrb[1].mxu0  ;;  %v348_v35 = vadd.f32 %v347_v32, %v293_v31 }
 0x1a2   :  { %v350_v36 = vadd.f32 %v349_v34, %v293_v31  ;;  %v351_v37 = vpop.f32.mrb[2].mxu0 }
 0x1a3   :  { %399 = vst [vmem:[%s541_s3] sm:$0xff] %v348_v35  ;;  %v352_v38 = vadd.f32 %v351_v37, %v298_v33  ;;  %v353_v39 = vpop.f32.mrb[3].mxu0 }
 0x1a4   :  { %v390_v40 = vpop.f32.mrb[0].mxu1  ;;  %400 = vst [vmem:[%s541_s3 + $0x8] sm:$0xff] %v350_v36  ;;  %v354_v41 = vadd.f32 %v353_v39, %v298_v33 }
 0x1a5   :  { %v391_v42 = vadd.f32 %v390_v40, %v293_v31  ;;  %401 = vst [vmem:[%s541_s3 + $0x10] sm:$0xff] %v352_v38  ;;  %v392_v43 = vpop.f32.mrb[1].mxu1 }
 0x1a6   :  { %402 = vst [vmem:[%s541_s3 + $0x18] sm:$0xff] %v354_v41  ;;  %v393_v44 = vadd.f32 %v392_v43, %v293_v31  ;;  %v394_v45 = vpop.f32.mrb[2].mxu1 }
 0x1a7   :  { %420 = vst [vmem:[%s541_s3 + $0x20] sm:$0xff] %v391_v42  ;;  %v395_v46 = vadd.f32 %v394_v45, %v298_v33  ;;  %v396_v47 = vpop.f32.mrb[3].mxu1 }
 0x1a8   :  { %421 = vst [vmem:[%s541_s3 + $0x28] sm:$0xff] %v393_v44  ;;  %v397_v48 = vadd.f32 %v396_v47, %v298_v33 }
 0x1a9   :  { %422 = vst [vmem:[%s541_s3 + $0x30] sm:$0xff] %v395_v46 }
 0x1aa   :  { %423 = vst [vmem:[%s541_s3 + $0x38] sm:$0xff] %v397_v48 }

</bundles_post_ra>
